<compile_context>
chip_gen: v7x
topology: tpu7x:2x2x1
jax: 0.10.0
libtpu: 0.0.40
codegen_flags: <defaults>
</compile_context>

<pallas_src>
import functools

import jax
import jax.numpy as jnp
from jax.experimental import pallas as pl
from jax.experimental.pallas import tpu as pltpu

_LANES = 128           # TPU lane width
_MAX_CHUNK_ROWS = 512  # sublane rows per grid step -> up to 64K elements / step


def _coxph_kernel(tri_ref, strict_ref, u_ref, e_ref, out_ref, acc_ref, *, eps):
    """One grid step processes a (R, 128) chunk of the sorted, shifted stream.

    acc_ref (SMEM f32[3]): [running sum of exp(u) over previous chunks,
                            numerator accumulator, sum(e) accumulator].
    """
    i = pl.program_id(0)

    @pl.when(i == 0)
    def _init():
        acc_ref[0] = jnp.float32(0.0)
        acc_ref[1] = jnp.float32(0.0)
        acc_ref[2] = jnp.float32(0.0)

    u = u_ref[...]                               # (R, 128) f32, shifted by max
    e = e_ref[...].astype(jnp.float32)           # (R, 128) 0/1 event indicator
    r, c = u.shape

    z = jnp.exp(u)                               # padded -inf -> 0

    # Inclusive prefix sum within each 128-lane row on the MXU.
    # tri[j, i] = 1 iff j <= i (loaded once, VMEM-resident).
    # Precision.HIGHEST keeps full f32 accuracy (no silent bf16 rounding of z).
    cs = jnp.dot(z, tri_ref[...],
                 preferred_element_type=jnp.float32,
                 precision=jax.lax.Precision.HIGHEST)           # (R, 128)

    # Exclusive prefix of per-row totals (carry across sublane rows).
    # Slice BEFORE the matmul: (R,R) @ (R,1) instead of (R,R) @ (R,128).
    row_tot = cs[:, c - 1:c]                                    # (R, 1)
    pre_last = jnp.dot(strict_ref[...], row_tot,
                       preferred_element_type=jnp.float32,
                       precision=jax.lax.Precision.HIGHEST)     # (R, 1)
    cumsum_local = cs + pre_last                                # inclusive in chunk

    carry = acc_ref[0]                                          # prev-chunk total
    log_cumsum = jnp.log(cumsum_local + carry + eps)

    # The where is load-bearing: padded slots carry u = -inf and (-inf) * 0
    # would be NaN; censored/padded slots have e = 0 and contribute nothing.
    acc_ref[1] += jnp.sum(jnp.where(e > 0, u - log_cumsum, 0.0))
    acc_ref[2] += jnp.sum(e)
    # Chunk total = sum of per-row totals (already computed; no (R,128) reduce).
    acc_ref[0] = carry + jnp.sum(row_tot)

    @pl.when(i == pl.num_programs(0) - 1)
    def _finalize():
        e_sum = acc_ref[2]
        denom = jnp.where(e_sum > 0.0, e_sum, jnp.float32(1.0))
        out_ref[0, 0] = -acc_ref[1] / denom


def coxph_loss(log_h, y, e, eps=1e-7, max_chunk_rows=_MAX_CHUNK_ROWS):
    """CoxPH negative partial log-likelihood. log_h, y, e: shape (batch,)."""
    log_h = jnp.asarray(log_h, jnp.float32).reshape(-1)
    e = jnp.asarray(e, jnp.float32).reshape(-1)
    y = jnp.asarray(y).reshape(-1)
    n = log_h.shape[0]

    # TODO(synk): argsort has no clean Pallas equivalent; the permutation by
    # descending duration stays in wrapper JAX.
    order = jnp.argsort(-y)
    lh = log_h[order]
    ev = e[order]

    gamma = jnp.max(lh)
    u = lh - gamma                     # gamma cancels in (log_h - log_cumsum_h)

    # Static (trace-time) tile choice: one chunk for small batches, up to
    # max_chunk_rows x 128 elements per grid step for large ones. Rows stay a
    # multiple of 16 so the bf16 event stream packs into full (16,128) tiles.
    max_chunk_rows = max(16, (int(max_chunk_rows) // 16) * 16)
    rows_needed = -(-n // _LANES)
    chunk_rows = min(max_chunk_rows, ((rows_needed + 15) // 16) * 16)
    chunk = chunk_rows * _LANES

    n_pad = ((n + chunk - 1) // chunk) * chunk
    pad = n_pad - n
    u = jnp.pad(u, (0, pad), constant_values=-jnp.inf)
    ev = jnp.pad(ev, (0, pad), constant_values=0.0)

    rows = n_pad // _LANES
    u2 = u.reshape(rows, _LANES)
    e2 = ev.reshape(rows, _LANES).astype(jnp.bfloat16)   # exact for 0/1 events
    steps = n_pad // chunk

    # Fixed triangular constants, DMA'd to VMEM once (constant index_map) and
    # reused every grid step instead of being rebuilt from iotas in-kernel.
    tri = jnp.triu(jnp.ones((_LANES, _LANES), jnp.float32))                 # j <= i
    strict = jnp.tril(jnp.ones((chunk_rows, chunk_rows), jnp.float32), -1)  # r' < r

    out = pl.pallas_call(
        functools.partial(_coxph_kernel, eps=float(eps)),
        out_shape=jax.ShapeDtypeStruct((1, 1), jnp.float32),
        grid_spec=pltpu.PrefetchScalarGridSpec(
            num_scalar_prefetch=0,
            grid=(steps,),
            in_specs=[
                pl.BlockSpec((_LANES, _LANES), lambda i: (0, 0)),
                pl.BlockSpec((chunk_rows, chunk_rows), lambda i: (0, 0)),
                pl.BlockSpec((chunk_rows, _LANES), lambda i: (i, 0)),
                pl.BlockSpec((chunk_rows, _LANES), lambda i: (i, 0)),
            ],
            out_specs=pl.BlockSpec((1, 1), lambda i: (0, 0),
                                   memory_space=pltpu.SMEM),
            scratch_shapes=[pltpu.SMEM((3,), jnp.float32)],
        ),
        compiler_params=pltpu.CompilerParams(
            # Sequential carry along the sorted axis -> keep "arbitrary".
            # TODO(synk): a two-pass decomposition (per-chunk totals -> host
            # scan -> parallel consumption) would let v7x use both TensorCores.
            dimension_semantics=("arbitrary",),
        ),
    )(tri, strict, u2, e2)
    return out[0, 0]


def _coxph_loss_ref(log_h, y, e, eps=1e-7):
    """Pure-JAX reference mirroring the PyTorch module."""
    order = jnp.argsort(-y)
    log_h = log_h[order]
    e = e[order]
    gamma = jnp.max(log_h)
    log_cumsum_h = jnp.log(jnp.cumsum(jnp.exp(log_h - gamma)) + eps) + gamma
    e_sum = jnp.sum(e)
    num = jnp.sum((log_h - log_cumsum_h) * e)
    return -num / jnp.where(e_sum > 0, e_sum, 1.0)


if __name__ == "__main__":
    key = jax.random.PRNGKey(0)

    def _check(batch, k, atol, rtol, max_chunk_rows=None):
        k1, k2, k3 = jax.random.split(k, 3)
        log_h = jax.random.normal(k1, (batch,), dtype=jnp.float32)
        y = jax.random.uniform(k2, (batch,), dtype=jnp.float32,
                               minval=0.0, maxval=10.0)
        e = (jax.random.uniform(k3, (batch,)) > 0.5).astype(jnp.float32)
        kwargs = {} if max_chunk_rows is None else {"max_chunk_rows": max_chunk_rows}
        loss = jax.block_until_ready(coxph_loss(log_h, y, e, **kwargs))
        ref = jax.block_until_ready(_coxph_loss_ref(log_h, y, e))
        assert jnp.isfinite(loss), ("non-finite loss", batch, loss)
        assert jnp.allclose(loss, ref, atol=atol, rtol=rtol), (batch, float(loss), float(ref))

    k_a, k_b, k_c = jax.random.split(key, 3)
    _check(8, k_a, atol=1e-5, rtol=1e-5)                        # tiny, single padded chunk
    _check(2500, k_b, atol=1e-5, rtol=1e-4)                     # single large chunk
    _check(2500, k_c, atol=1e-5, rtol=1e-4, max_chunk_rows=16)  # multi-chunk carry path
    print("KERNEL_OK")
</pallas_src>

<mosaic_0001>
module attributes {stable_mosaic.version = 11 : i64} {
  func.func @_coxph_kernel(%arg0: i32, %arg1: memref<128x128xf32, #tpu.memory_space<vmem>>, %arg2: memref<16x16xf32, #tpu.memory_space<vmem>>, %arg3: memref<16x128xf32, #tpu.memory_space<vmem>>, %arg4: memref<16x128xbf16, #tpu.memory_space<vmem>>, %arg5: memref<1x1xf32, #tpu.memory_space<smem>>, %arg6: memref<3xf32, #tpu.memory_space<smem>>) attributes {dimension_semantics = [#tpu.dimension_semantics<arbitrary>], iteration_bounds = array<i64: 1>, scalar_prefetch = 0 : i64, scratch_operands = 1 : i64, tpu.core_type = #tpu.core_type<tc>, window_params = [{pipeline_mode = #tpu.pipeline_mode<synchronous>, transform_indices = @transform_0, window_bounds = array<i64: 128, 128>}, {pipeline_mode = #tpu.pipeline_mode<synchronous>, transform_indices = @transform_1, window_bounds = array<i64: 16, 16>}, {transform_indices = @transform_2, window_bounds = array<i64: 16, 128>}, {transform_indices = @transform_3, window_bounds = array<i64: 16, 128>}, {transform_indices = @transform_4, window_bounds = array<i64: 1, 1>}]} {
    %c0_i32 = arith.constant 0 : i32
    %0 = arith.cmpi eq, %arg0, %c0_i32 : i32
    %1 = arith.extui %0 : i1 to i32
    %c0_i32_0 = arith.constant 0 : i32
    %2 = arith.cmpi ne, %1, %c0_i32_0 : i32
    scf.if %2 {
      %cst_21 = arith.constant 0.000000e+00 : f32
      %c0_22 = arith.constant 0 : index
      %48 = memref.load %arg6[%c0_22] : memref<3xf32, #tpu.memory_space<smem>>
      memref.store %cst_21, %arg6[%c0_22] : memref<3xf32, #tpu.memory_space<smem>>
      %cst_23 = arith.constant 0.000000e+00 : f32
      %c1_24 = arith.constant 1 : index
      %49 = memref.load %arg6[%c1_24] : memref<3xf32, #tpu.memory_space<smem>>
      memref.store %cst_23, %arg6[%c1_24] : memref<3xf32, #tpu.memory_space<smem>>
      %cst_25 = arith.constant 0.000000e+00 : f32
      %c2_26 = arith.constant 2 : index
      %50 = memref.load %arg6[%c2_26] : memref<3xf32, #tpu.memory_space<smem>>
      memref.store %cst_25, %arg6[%c2_26] : memref<3xf32, #tpu.memory_space<smem>>
    } else {
    }
    %c0 = arith.constant 0 : index
    %c0_1 = arith.constant 0 : index
    %3 = vector.load %arg3[%c0, %c0_1] : memref<16x128xf32, #tpu.memory_space<vmem>>, vector<16x128xf32>
    %c0_2 = arith.constant 0 : index
    %c0_3 = arith.constant 0 : index
    %4 = vector.load %arg4[%c0_2, %c0_3] : memref<16x128xbf16, #tpu.memory_space<vmem>>, vector<16x128xbf16>
    %5 = arith.extf %4 : vector<16x128xbf16> to vector<16x128xf32>
    %6 = math.exp %3 : vector<16x128xf32>
    %c0_4 = arith.constant 0 : index
    %c0_5 = arith.constant 0 : index
    %7 = vector.load %arg1[%c0_4, %c0_5] : memref<128x128xf32, #tpu.memory_space<vmem>>, vector<128x128xf32>
    %cst = arith.constant dense<0.000000e+00> : vector<16x128xf32>
    %8 = tpu.matmul %6, %7, %cst {dimension_numbers = #tpu.dot_dimension_numbers<[1], [0], [0], [1], [0, 0, 1, 1], [], []>, precision = #tpu.contract_precision<fp32>} : vector<16x128xf32>, vector<128x128xf32>, vector<16x128xf32> -> vector<16x128xf32>
    %9 = vector.extract_strided_slice %8 {offsets = [0, 127], sizes = [16, 1], strides = [1, 1]} : vector<16x128xf32> to vector<16x1xf32>
    %c0_6 = arith.constant 0 : index
    %c0_7 = arith.constant 0 : index
    %10 = vector.load %arg2[%c0_6, %c0_7] : memref<16x16xf32, #tpu.memory_space<vmem>>, vector<16x16xf32>
    %cst_8 = arith.constant dense<0.000000e+00> : vector<16x1xf32>
    %11 = tpu.matmul %10, %9, %cst_8 {dimension_numbers = #tpu.dot_dimension_numbers<[1], [0], [0], [1], [0, 0, 1, 1], [], []>, precision = #tpu.contract_precision<fp32>} : vector<16x16xf32>, vector<16x1xf32>, vector<16x1xf32> -> vector<16x1xf32>
    %12 = vector.broadcast %11 : vector<16x1xf32> to vector<16x128xf32>
    %13 = arith.addf %8, %12 : vector<16x128xf32>
    %c0_9 = arith.constant 0 : index
    %14 = memref.load %arg6[%c0_9] : memref<3xf32, #tpu.memory_space<smem>>
    %15 = vector.broadcast %14 : f32 to vector<16x128xf32>
    %16 = arith.addf %13, %15 : vector<16x128xf32>
    %cst_10 = arith.constant 1.000000e-07 : f32
    %17 = vector.broadcast %cst_10 : f32 to vector<16x128xf32>
    %18 = arith.addf %16, %17 : vector<16x128xf32>
    %19 = math.log %18 : vector<16x128xf32>
    %c1 = arith.constant 1 : index
    %20 = memref.load %arg6[%c1] : memref<3xf32, #tpu.memory_space<smem>>
    %cst_11 = arith.constant 0.000000e+00 : f32
    %21 = vector.broadcast %cst_11 : f32 to vector<16x128xf32>
    %22 = arith.cmpf ogt, %5, %21 : vector<16x128xf32>
    %23 = arith.subf %3, %19 : vector<16x128xf32>
    %cst_12 = arith.constant 0.000000e+00 : f32
    %24 = vector.broadcast %cst_12 : f32 to vector<16x128xf32>
    %25 = arith.select %22, %23, %24 : vector<16x128xi1>, vector<16x128xf32>
    %26 = vector.shape_cast %25 : vector<16x128xf32> to vector<1x16x128xf32>
    %cst_13 = arith.constant dense<0.000000e+00> : vector<1xf32>
    %27 = vector.multi_reduction <add>, %26, %cst_13 [1, 2] : vector<1x16x128xf32> to vector<1xf32>
    %28 = vector.shape_cast %27 : vector<1xf32> to vector<1x1x1xf32>
    %29 = vector.extract %28[0, 0, 0] : f32 from vector<1x1x1xf32>
    %30 = arith.addf %20, %29 : f32
    %c1_14 = arith.constant 1 : index
    %31 = memref.load %arg6[%c1_14] : memref<3xf32, #tpu.memory_space<smem>>
    memref.store %30, %arg6[%c1_14] : memref<3xf32, #tpu.memory_space<smem>>
    %c2 = arith.constant 2 : index
    %32 = memref.load %arg6[%c2] : memref<3xf32, #tpu.memory_space<smem>>
    %33 = vector.shape_cast %5 : vector<16x128xf32> to vector<1x16x128xf32>
    %cst_15 = arith.constant dense<0.000000e+00> : vector<1xf32>
    %34 = vector.multi_reduction <add>, %33, %cst_15 [1, 2] : vector<1x16x128xf32> to vector<1xf32>
    %35 = vector.shape_cast %34 : vector<1xf32> to vector<1x1x1xf32>
    %36 = vector.extract %35[0, 0, 0] : f32 from vector<1x1x1xf32>
    %37 = arith.addf %32, %36 : f32
    %c2_16 = arith.constant 2 : index
    %38 = memref.load %arg6[%c2_16] : memref<3xf32, #tpu.memory_space<smem>>
    memref.store %37, %arg6[%c2_16] : memref<3xf32, #tpu.memory_space<smem>>
    %39 = vector.shape_cast %9 : vector<16x1xf32> to vector<1x16x1xf32>
    %cst_17 = arith.constant dense<0.000000e+00> : vector<1xf32>
    %40 = vector.multi_reduction <add>, %39, %cst_17 [1, 2] : vector<1x16x1xf32> to vector<1xf32>
    %41 = vector.shape_cast %40 : vector<1xf32> to vector<1x1x1xf32>
    %42 = vector.extract %41[0, 0, 0] : f32 from vector<1x1x1xf32>
    %43 = arith.addf %14, %42 : f32
    %c0_18 = arith.constant 0 : index
    %44 = memref.load %arg6[%c0_18] : memref<3xf32, #tpu.memory_space<smem>>
    memref.store %43, %arg6[%c0_18] : memref<3xf32, #tpu.memory_space<smem>>
    %c0_i32_19 = arith.constant 0 : i32
    %45 = arith.cmpi eq, %arg0, %c0_i32_19 : i32
    %46 = arith.extui %45 : i1 to i32
    %c0_i32_20 = arith.constant 0 : i32
    %47 = arith.cmpi ne, %46, %c0_i32_20 : i32
    scf.if %47 {
      %c2_21 = arith.constant 2 : index
      %48 = memref.load %arg6[%c2_21] : memref<3xf32, #tpu.memory_space<smem>>
      %cst_22 = arith.constant 0.000000e+00 : f32
      %49 = arith.cmpf ogt, %48, %cst_22 : f32
      %cst_23 = arith.constant 1.000000e+00 : f32
      %50 = arith.select %49, %48, %cst_23 : f32
      %c1_24 = arith.constant 1 : index
      %51 = memref.load %arg6[%c1_24] : memref<3xf32, #tpu.memory_space<smem>>
      %cst_25 = arith.constant 0.000000e+00 : f32
      %52 = arith.subf %cst_25, %51 : f32
      %53 = arith.divf %52, %50 : f32
      %c0_26 = arith.constant 0 : index
      %c0_27 = arith.constant 0 : index
      %54 = memref.load %arg5[%c0_26, %c0_27] : memref<1x1xf32, #tpu.memory_space<smem>>
      memref.store %53, %arg5[%c0_26, %c0_27] : memref<1x1xf32, #tpu.memory_space<smem>>
    } else {
    }
    return
  }
  func.func @transform_0(%arg0: i32) -> (i32, i32) {
    %c0_i32 = arith.constant 0 : i32
    %c0_i32_0 = arith.constant 0 : i32
    %c0_i32_1 = arith.constant 0 : i32
    return %c0_i32, %c0_i32_0 : i32, i32
  }
  func.func @transform_1(%arg0: i32) -> (i32, i32) {
    %c0_i32 = arith.constant 0 : i32
    %c0_i32_0 = arith.constant 0 : i32
    %c0_i32_1 = arith.constant 0 : i32
    return %c0_i32, %c0_i32_0 : i32, i32
  }
  func.func @transform_2(%arg0: i32) -> (i32, i32) {
    %c0_i32 = arith.constant 0 : i32
    %c0_i32_0 = arith.constant 0 : i32
    return %arg0, %c0_i32 : i32, i32
  }
  func.func @transform_3(%arg0: i32) -> (i32, i32) {
    %c0_i32 = arith.constant 0 : i32
    %c0_i32_0 = arith.constant 0 : i32
    return %arg0, %c0_i32 : i32, i32
  }
  func.func @transform_4(%arg0: i32) -> (i32, i32) {
    %c0_i32 = arith.constant 0 : i32
    %c0_i32_0 = arith.constant 0 : i32
    %c0_i32_1 = arith.constant 0 : i32
    return %c0_i32, %c0_i32_0 : i32, i32
  }
}

</mosaic_0001>

<bundles_post_ra>
// kernel: tpu_custom_call.1
= control target key start
LH: loop header
LB: loop body
LE: loop exit
PB: predicated region body
PF: predicated region fallthrough
CT: control target
= control target key end

     0   :  { %9 = vsyncpa [#allocation4], 0  ;;  %s2519_s0 = inlined_call_operand.hbm [shape: f32[128,128], index: 0, kind: input, shape index: {}]   ;;  %s2520_s1 = inlined_call_operand.hbm [shape: f32[16,16], index: 1, kind: input, shape index: {}]   ;;  %s2521_s2 = inlined_call_operand.hbm [shape: f32[16,128], index: 2, kind: input, shape index: {}]   ;;  %s2522_s3 = inlined_call_operand.vmem [shape: bf16[16,128], index: 3, kind: input, shape index: {}]   ;;  %s2523_s4 = inlined_call_operand.hbm [shape: f32[1,1], index: 4, kind: output, shape index: {}]  }
   0x1   :  { %10 = vsyncpa [#allocation7], 0 }
   0x2   :  { %11 = vsyncpa [#allocation5], 0  ;;  %s2135_s15 = smov [#allocation6]   ;;  %s2136_s17 = smov [#allocation3]  }
   0x3   :  { %s29_s16 = sshll.u32 %s2135_s15, 4  ;;  %s17_s18 = sshll.u32 %s2136_s17, 4  ;;  %s30_s16 = int_to_ptr.vmem [resolvable:$true] %s29_s16  ;;  %s2168_s18 = int_to_ptr.vmem [resolvable:$true] %s17_s18 }
   0x4   :  { %s2053_s21 = scalar_lea.hbm %s2520_s1, 256 }
   0x5   :  { %p2054_p0 = scmp.ne.s32.totalorder %s2520_s1, %s2053_s21  ;;  %p2057_p1 = scmp.lt.u32.totalorder %s2053_s21, %s2520_s1 }
   0x7   :  { %p2059_p2 = pnand %p2057_p1, %p2054_p0 }
   0x9   :  { %2062 = shalt.err (!%p2059_p2)
}
   0xa   :  { %s2063_s26 = scalar_lea.vmem %s30_s16, 256  ;;  %p2068_p4 = scmp.lt.s32.totalorder %s30_s16, %s30_s16 }
   0xb   :  { %p2064_p3 = scmp.ne.s32.totalorder %s30_s16, %s2063_s26  ;;  %p2069_p5 = scmp.lt.s32.totalorder %s2063_s26, %s2063_s26 }
   0xd   :  { %p2070_p6 = por %p2069_p5, %p2068_p4 }
   0xf   :  { %p2071_p7 = pnand %p2070_p6, %p2064_p3 }
  0x11   :  { %2074 = shalt.err (!%p2071_p7)
}
  0x12   :  { %s2137_s27 = smov 128   ;;  %s2138_s28 = smov 8  }
  0x13   :  { %35 = dma.hbm_to_vmem [thread:$0]  %s2520_s1, 256, %s30_s16, [#allocation7], %s2137_s27, %s2137_s27, %s2138_s28  }
  0x14   :  { %s2075_s7 = scalar_lea.hbm %s2519_s0, 2048 }
  0x15   :  { %p2076_p8 = scmp.ne.s32.totalorder %s2519_s0, %s2075_s7  ;;  %p2079_p9 = scmp.lt.u32.totalorder %s2075_s7, %s2519_s0 }
  0x17   :  { %p2081_p10 = pnand %p2079_p9, %p2076_p8 }
  0x19   :  { %2084 = shalt.err (!%p2081_p10)
}
  0x1a   :  { %s2085_s12 = scalar_lea.vmem %s2168_s18, 2048  ;;  %p2090_p12 = scmp.lt.s32.totalorder %s2168_s18, %s2168_s18 }
  0x1b   :  { %p2086_p11 = scmp.ne.s32.totalorder %s2168_s18, %s2085_s12  ;;  %p2091_p13 = scmp.lt.s32.totalorder %s2085_s12, %s2085_s12 }
  0x1d   :  { %p2092_p0 = por %p2091_p13, %p2090_p12 }
  0x1f   :  { %p2093_p1 = pnand %p2092_p0, %p2086_p11 }
  0x21   :  { %2096 = shalt.err (!%p2093_p1)
}
  0x22   :  { %23 = dma.hbm_to_vmem [thread:$0]  %s2519_s0, 2048, %s2168_s18, [#allocation4], %s2137_s27, %s2137_s27, %s2138_s28  }
  0x23   :  { %s2139_s14 = smov [#allocation8]   ;;  %s2097_s19 = scalar_lea.hbm %s2521_s2, 256 }
  0x24   :  { %s41_s15 = sshll.u32 %s2139_s14, 4  ;;  %p2098_p2 = scmp.ne.s32.totalorder %s2521_s2, %s2097_s19  ;;  %s42_s15 = int_to_ptr.vmem [resolvable:$true] %s41_s15 }
  0x25   :  { %p2101_p3 = scmp.lt.u32.totalorder %s2097_s19, %s2521_s2 }
  0x27   :  { %p2103_p4 = pnand %p2101_p3, %p2098_p2 }
  0x29   :  { %2106 = shalt.err (!%p2103_p4)
}
  0x2a   :  { %s2107_s24 = scalar_lea.vmem %s42_s15, 256  ;;  %p2112_p6 = scmp.lt.s32.totalorder %s42_s15, %s42_s15 }
  0x2b   :  { %p2108_p5 = scmp.ne.s32.totalorder %s42_s15, %s2107_s24  ;;  %p2113_p7 = scmp.lt.s32.totalorder %s2107_s24, %s2107_s24 }
  0x2d   :  { %p2114_p8 = por %p2113_p7, %p2112_p6 }
  0x2f   :  { %p2115_p9 = pnand %p2114_p8, %p2108_p5 }
  0x31   :  { %2118 = shalt.err (!%p2115_p9)
}
  0x32   :  { %47 = dma.hbm_to_vmem [thread:$0]  %s2521_s2, 256, %s42_s15, [#allocation7], %s2137_s27, %s2137_s27, %s2138_s28  }
  0x33   :  { %2129 = dma.done.wait [#allocation4], 2048  }
  0x34   :  { %2130 = vsyncadd [#allocation4], 4294965248 }
  0x35   :  { %2131 = dma.done.wait [#allocation7], 512  }
  0x36   :  { %2132 = vsyncadd [#allocation7], 4294966784  ;;  %v79_v0 = vld [vmem:[#allocation3] sm:$0xff]  ;;  %v80_v1 = vld [vmem:[#allocation3 + $0x8] sm:$0xff]  ;;  %vm789_vm0 = vcmask 130048   ;;  %s2140_s2 = smov 1  }
  0x37   :  { %v81_v2 = vld [vmem:[#allocation3 + $0x10] sm:$0xff]  ;;  %v96_v3 = vand.u32 4294901760, %v79_v0  ;;  %v99_v4 = vand.u32 4294901760, %v80_v1  ;;  %v2220_v5 = vld [vmem:[#allocation3 + $0x18] sm:$0xff]  ;;  %v2222_v7 = vld [vmem:[#allocation3 + $0x20] sm:$0xff]  ;;  %s2119_s7 = scalar_lea.hbm %s2523_s4, 16 }
  0x38   :  { %v102_v6 = vand.u32 4294901760, %v81_v2  ;;  %v2224_v8 = vld [vmem:[#allocation3 + $0x28] sm:$0xff]  ;;  %v105_v9 = vand.u32 4294901760, %v2220_v5  ;;  %v108_v11 = vand.u32 4294901760, %v2222_v7  ;;  %v2233_v14 = vld [vmem:[#allocation3 + $0x30] sm:$0xff]  ;;  %v2235_v15 = vld [vmem:[#allocation3 + $0x38] sm:$0xff]  ;;  %p2120_p11 = scmp.ne.s32.totalorder %s2523_s4, %s2119_s7  ;;  %p2123_p12 = scmp.lt.u32.totalorder %s2119_s7, %s2523_s4 }
  0x39   :  { %v2227_v10 = vpack.c.bf16 %v99_v4, %v96_v3  ;;  %v111_v12 = vand.u32 4294901760, %v2224_v8  ;;  %v2239_v16 = vld [vmem:[#allocation8] sm:$0xff]  ;;  %v2241_v17 = vld [vmem:[#allocation8 + $0x8] sm:$0xff]  ;;  %v114_v20 = vand.u32 4294901760, %v2233_v14  ;;  %v117_v21 = vand.u32 4294901760, %v2235_v15  ;;  %v2257_v23 = vld [vmem:[#allocation3 + $0x40] sm:$0xff] }
  0x3a   :  { %v2231_v13 = vpack.c.bf16 %v105_v9, %v102_v6  ;;  %v75_v18 = vmul.f32 1.442695, %v2239_v16  ;;  %v77_v22 = vmul.f32 1.442695, %v2241_v17  ;;  %v2259_v24 = vld [vmem:[#allocation3 + $0x48] sm:$0xff]  ;;  %v120_v26 = vand.u32 4294901760, %v2257_v23  ;;  %p2125_p13 = pnand %p2123_p12, %p2120_p11 }
  0x3b   :  { %1792 = vmatprep.subr.bf16.mxu1 %v2227_v10  ;;  %1888 = vmatprep.subr.bf16.mxu0 %v2227_v10  ;;  %v2252_v19 = vpack.c.bf16 %v111_v12, %v108_v11  ;;  %v2269_v25 = vpack.c.bf16 %v117_v21, %v114_v20  ;;  %v123_v27 = vand.u32 4294901760, %v2259_v24  ;;  %v2273_v28 = vld [vmem:[#allocation3 + $0x50] sm:$0xff]  ;;  %v2275_v29 = vld [vmem:[#allocation3 + $0x58] sm:$0xff]  ;;  %v2281_v32 = vld [vmem:[#allocation3 + $0x60] sm:$0xff]  ;;  %v2293_v35 = vsub.f32 %v79_v0, %v96_v3 }
  0x3c   :  { %1794 = vmatpush3.bf16.msra.mxu1 %v2227_v10  ;;  %1890 = vmatpush3.bf16.msra.mxu0 %v2227_v10  ;;  %2043 = vpow2.f32 %v75_v18  ;;  %v126_v30 = vand.u32 4294901760, %v2273_v28  ;;  %v129_v31 = vand.u32 4294901760, %v2275_v29  ;;  %v2283_v33 = vld [vmem:[#allocation3 + $0x68] sm:$0xff]  ;;  %v2295_v36 = vsub.f32 %v80_v1, %v99_v4  ;;  %v2307_v41 = vld [vmem:[#allocation3 + $0x70] sm:$0xff]  ;;  %v2309_v42 = vld [vmem:[#allocation3 + $0x78] sm:$0xff] }
  0x3d   :  { %1796 = vmatprep.subr.bf16.mxu1 %v2231_v13  ;;  %1892 = vmatprep.subr.bf16.mxu0 %v2231_v13  ;;  %2045 = vpow2.f32 %v77_v22  ;;  %v2291_v34 = vpack.c.bf16 %v123_v27, %v120_v26  ;;  %v132_v37 = vand.u32 4294901760, %v2281_v32  ;;  %v135_v38 = vand.u32 4294901760, %v2283_v33 }
  0x3e   :  { %v2305_v40 = vpack.c.bf16 %v129_v31, %v126_v30  ;;  %v2311_v43 = vsub.f32 %v81_v2, %v102_v6  ;;  %v199_v46 = vand.u32 4294901760, %v2293_v35  ;;  %v206_v47 = vand.u32 4294901760, %v2295_v36 }
  0x3f   :  { %v2320_v48 = vsub.f32 %v2220_v5, %v105_v9  ;;  %v2328_v50 = vpack.c.bf16 %v135_v38, %v132_v37  ;;  %v138_v51 = vand.u32 4294901760, %v2307_v41  ;;  %v141_v52 = vand.u32 4294901760, %v2309_v42 }
  0x40   :  { %1798 = vmatpush3.bf16.msra.mxu1 %v2231_v13  ;;  %1894 = vmatpush3.bf16.msra.mxu0 %v2231_v13  ;;  %v213_v55 = vand.u32 4294901760, %v2311_v43  ;;  %v2344_v56 = vsub.f32 %v2222_v7, %v108_v11  ;;  %v2349_v57 = vsub.f32 %v2224_v8, %v111_v12  ;;  %v200_v59 = vsub.f32 %v2293_v35, %v199_v46 }
  0x41   :  { %1800 = vmatprep.subr.bf16.mxu1 %v2252_v19  ;;  %1896 = vmatprep.subr.bf16.mxu0 %v2252_v19  ;;  %v207_v60 = vsub.f32 %v2295_v36, %v206_v47  ;;  %v220_v61 = vand.u32 4294901760, %v2320_v48  ;;  %v2362_v0 = vsub.f32 %v2233_v14, %v114_v20  ;;  %v2367_v1 = vsub.f32 %v2235_v15, %v117_v21 }
  0x42   :  { %v2375_v2 = vpack.c.bf16 %v141_v52, %v138_v51  ;;  %v214_v3 = vsub.f32 %v2311_v43, %v213_v55  ;;  %v227_v4 = vand.u32 4294901760, %v2344_v56  ;;  %v234_v5 = vand.u32 4294901760, %v2349_v57 }
  0x43   :  { %v201_v7 = vand.u32 4294901760, %v200_v59  ;;  %v208_v8 = vand.u32 4294901760, %v207_v60  ;;  %v221_v9 = vsub.f32 %v2320_v48, %v220_v61  ;;  %v1919_v11 = vpack.c.bf16 %v206_v47, %v199_v46 }
  0x44   :  { %1802 = vmatpush3.bf16.msra.mxu1 %v2252_v19  ;;  %1898 = vmatpush3.bf16.msra.mxu0 %v2252_v19  ;;  %v241_v14 = vand.u32 4294901760, %v2362_v0  ;;  %v248_v15 = vand.u32 4294901760, %v2367_v1  ;;  %v228_v18 = vsub.f32 %v2344_v56, %v227_v4  ;;  %v2392_v20 = vsub.f32 %v2257_v23, %v120_v26 }
  0x45   :  { %1804 = vmatprep.subr.bf16.mxu1 %v2269_v25  ;;  %1900 = vmatprep.subr.bf16.mxu0 %v2269_v25  ;;  %v2397_v21 = vsub.f32 %v2259_v24, %v123_v27  ;;  %v1823_v22 = vpack.c.bf16 %v208_v8, %v201_v7  ;;  %v235_v46 = vsub.f32 %v2349_v57, %v234_v5 }
  0x46   :  { %v2044_v39 = vpop.eup %2043  ;;  %v249_v23 = vsub.f32 %v2367_v1, %v248_v15  ;;  %v255_v24 = vand.u32 4294901760, %v2392_v20  ;;  %v2411_v27 = vsub.f32 %v2273_v28, %v126_v30  ;;  %v2416_v59 = vsub.f32 %v2275_v29, %v129_v31 }
  0x47   :  { %v2046_v44 = vpop.eup %2045  ;;  %v2315_v45 = vand.u32 4294901760, %v2044_v39  ;;  %v262_v26 = vand.u32 4294901760, %v2397_v21  ;;  %v1927_v7 = vpack.c.bf16 %v234_v5, %v227_v4  ;;  %v1931_v5 = vpack.c.bf16 %v248_v15, %v241_v14 }
  0x48   :  { %1806 = vmatpush3.bf16.msra.mxu1 %v2269_v25  ;;  %1902 = vmatpush3.bf16.msra.mxu0 %v2269_v25  ;;  %v2322_v49 = vand.u32 4294901760, %v2046_v44  ;;  %v256_v28 = vsub.f32 %v2392_v20, %v255_v24  ;;  %v269_v29 = vand.u32 4294901760, %v2411_v27  ;;  %v276_v31 = vand.u32 4294901760, %v2416_v59 }
  0x49   :  { %1808 = vmatprep.subr.bf16.mxu1 %v2291_v34  ;;  %1904 = vmatprep.subr.bf16.mxu0 %v2291_v34  ;;  %v2333_v53 = vsub.f32 %v2044_v39, %v2315_v45  ;;  %v215_v39 = vand.u32 4294901760, %v214_v3  ;;  %v229_v3 = vand.u32 4294901760, %v228_v18  ;;  %v263_v30 = vsub.f32 %v2397_v21, %v262_v26 }
  0x4a   :  { %v2338_v54 = vsub.f32 %v2046_v44, %v2322_v49  ;;  %v222_v44 = vand.u32 4294901760, %v221_v9  ;;  %v250_v9 = vand.u32 4294901760, %v249_v23  ;;  %v270_v18 = vsub.f32 %v2411_v27, %v269_v29 }
  0x4b   :  { %v178_v58 = vand.u32 4294901760, %v2333_v53 }
  0x4c   :  { %1810 = vmatpush3.bf16.msra.mxu1 %v2291_v34  ;;  %1906 = vmatpush3.bf16.msra.mxu0 %v2291_v34  ;;  %v188_v63 = vand.u32 4294901760, %v2338_v54  ;;  %v1827_v60 = vpack.c.bf16 %v222_v44, %v215_v39  ;;  %v271_v39 = vand.u32 4294901760, %v270_v18 }
  0x4d   :  { %1812 = vmatprep.subr.bf16.mxu1 %v2305_v40  ;;  %1908 = vmatprep.subr.bf16.mxu0 %v2305_v40  ;;  %v179_v62 = vsub.f32 %v2333_v53, %v178_v58 }
  0x4e   :  { %1676 = vmatprep.mubr.f32.mxu0 %v178_v58  ;;  %v189_v12 = vsub.f32 %v2338_v54, %v188_v63  ;;  %v242_v58 = vsub.f32 %v2362_v0, %v241_v14  ;;  %v2446_v14 = vsub.f32 %v2309_v42, %v141_v52  ;;  %v1939_v52 = vpack.c.bf16 %v276_v31, %v269_v29 }
  0x4f   :  { %v180_v6 = vand.u32 4294901760, %v179_v62  ;;  %v1923_v62 = vpack.c.bf16 %v220_v61, %v213_v55  ;;  %v2425_v61 = vsub.f32 %v2281_v32, %v132_v37  ;;  %v277_v32 = vsub.f32 %v2416_v59, %v276_v31 }
  0x50   :  { %1814 = vmatpush3.bf16.msra.mxu1 %v2305_v40  ;;  %1910 = vmatpush3.bf16.msra.mxu0 %v2305_v40  ;;  %v190_v47 = vand.u32 4294901760, %v189_v12  ;;  %v243_v8 = vand.u32 4294901760, %v242_v58  ;;  %v264_v12 = vand.u32 4294901760, %v263_v30 }
  0x51   :  { %1816 = vmatprep.subr.bf16.mxu1 %v2328_v50  ;;  %1912 = vmatprep.subr.bf16.mxu0 %v2328_v50  ;;  %v283_v37 = vand.u32 4294901760, %v2425_v61  ;;  %v278_v44 = vand.u32 4294901760, %v277_v32 }
  0x52   :  { %1571 = vmatprep.mubr.f32.mxu1 %v180_v6  ;;  %v236_v6 = vand.u32 4294901760, %v235_v46  ;;  %v1835_v4 = vpack.c.bf16 %v250_v9, %v243_v8  ;;  %v1855_v9 = vpack.c.bf16 %v2295_v36, %v2293_v35  ;;  %v1863_v35 = vpack.c.bf16 %v2349_v57, %v2344_v56 }
  0x53   :  { %v284_v46 = vsub.f32 %v2425_v61, %v283_v37  ;;  %v1843_v42 = vpack.c.bf16 %v278_v44, %v271_v39  ;;  %v1867_v36 = vpack.c.bf16 %v2367_v1, %v2362_v0  ;;  %v2141_v39 = vmov 0  }
  0x54   :  { %1818 = vmatpush3.bf16.msra.mxu1 %v2328_v50  ;;  %1914 = vmatpush3.bf16.msra.mxu0 %v2328_v50  ;;  %v1831_v55 = vpack.c.bf16 %v236_v6, %v229_v3 }
  0x55   :  { %1820 = vmatprep.subr.bf16.mxu1 %v2375_v2  ;;  %1916 = vmatprep.subr.bf16.mxu0 %v2375_v2  ;;  %v285_v58 = vand.u32 4294901760, %v284_v46 }
  0x56   :  { %2041 = vset.pattern.permute.xlu1 %v2141_v39  ;;  %2042 = vset.pattern.permute.xlu0 %v2141_v39 }
  0x58   :  { %1822 = vmatpush3.bf16.msra.mxu1 %v2375_v2  ;;  %1918 = vmatpush3.bf16.msra.mxu0 %v2375_v2 }
  0x59   :  { %1824 = vmatprep.subr.bf16.mxu1 %v1823_v22  ;;  %1920 = vmatprep.subr.bf16.mxu0 %v1919_v11 }
  0x5b   :  { %1572 = vmatmul.mubr.f32.vlgmr.msra.gmra.mrb[0].mxu1 %v190_v47  ;;  %1677 = vmatmul.mubr.f32.vlgmr.msra.gmra.mrb[0].mxu0 %v188_v63  ;;  %v2430_v63 = vsub.f32 %v2283_v33, %v135_v38  ;;  %v2441_v38 = vsub.f32 %v2307_v41, %v138_v51  ;;  %v304_v51 = vand.u32 4294901760, %v2446_v14 }
  0x5c   :  { %1826 = vmatpush3.bf16.msra.mxu1 %v1823_v22  ;;  %1922 = vmatpush3.bf16.msra.mxu0 %v1919_v11  ;;  %v257_v11 = vand.u32 4294901760, %v256_v28  ;;  %v1935_v22 = vpack.c.bf16 %v262_v26, %v255_v24  ;;  %v1859_v28 = vpack.c.bf16 %v2320_v48, %v2311_v43 }
  0x5d   :  { %1828 = vmatprep.subr.bf16.mxu1 %v1827_v60  ;;  %1924 = vmatprep.subr.bf16.mxu0 %v1923_v62  ;;  %v290_v33 = vand.u32 4294901760, %v2430_v63  ;;  %v297_v41 = vand.u32 4294901760, %v2441_v38  ;;  %v305_v26 = vsub.f32 %v2446_v14, %v304_v51 }
  0x5e   :  { %1606 = vmatprep.mubr.f32.mxu1 %v2315_v45  ;;  %1711 = vmatprep.mubr.f32.mxu0 %v2315_v45  ;;  %v1839_v15 = vpack.c.bf16 %v264_v12, %v257_v11 }
  0x5f   :  { %v291_v47 = vsub.f32 %v2430_v63, %v290_v33  ;;  %v298_v24 = vsub.f32 %v2441_v38, %v297_v41  ;;  %v306_v6 = vand.u32 4294901760, %v305_v26  ;;  %v1947_v8 = vpack.c.bf16 %v304_v51, %v297_v41 }
  0x60   :  { %1830 = vmatpush3.bf16.msra.mxu1 %v1827_v60  ;;  %1926 = vmatpush3.bf16.msra.mxu0 %v1923_v62  ;;  %v1943_v62 = vpack.c.bf16 %v290_v33, %v283_v37 }
  0x61   :  { %1832 = vmatprep.subr.bf16.mxu1 %v1831_v55  ;;  %1928 = vmatprep.subr.bf16.mxu0 %v1927_v7  ;;  %v292_v23 = vand.u32 4294901760, %v291_v47  ;;  %v299_v3 = vand.u32 4294901760, %v298_v24 }
  0x63   :  { %v1847_v60 = vpack.c.bf16 %v292_v23, %v285_v58 }
  0x64   :  { %1834 = vmatpush3.bf16.msra.mxu1 %v1831_v55  ;;  %1930 = vmatpush3.bf16.msra.mxu0 %v1927_v7  ;;  %v1851_v7 = vpack.c.bf16 %v306_v6, %v299_v3 }
  0x65   :  { %1836 = vmatprep.subr.bf16.mxu1 %v1835_v4  ;;  %1932 = vmatprep.subr.bf16.mxu0 %v1931_v5 }
  0x68   :  { %1838 = vmatpush3.bf16.msra.mxu1 %v1835_v4  ;;  %1934 = vmatpush3.bf16.msra.mxu0 %v1931_v5 }
  0x69   :  { %1840 = vmatprep.subr.bf16.mxu1 %v1839_v15  ;;  %1936 = vmatprep.subr.bf16.mxu0 %v1935_v22 }
  0x6c   :  { %1842 = vmatpush3.bf16.msra.mxu1 %v1839_v15  ;;  %1938 = vmatpush3.bf16.msra.mxu0 %v1935_v22 }
  0x6d   :  { %1844 = vmatprep.subr.bf16.mxu1 %v1843_v42  ;;  %1940 = vmatprep.subr.bf16.mxu0 %v1939_v52 }
  0x70   :  { %1846 = vmatpush3.bf16.msra.mxu1 %v1843_v42  ;;  %1942 = vmatpush3.bf16.msra.mxu0 %v1939_v52  ;;  %v1404_v52 = vld [vmem:[%s2522_s3] sm:$0xff]  }
  0x71   :  { %1848 = vmatprep.subr.bf16.mxu1 %v1847_v60  ;;  %1944 = vmatprep.subr.bf16.mxu0 %v1943_v62  ;;  %v1405_v58 = vunpack.c.l.bf16 %v1404_v52  ;;  %v1406_v23 = vunpack.c.h.bf16 %v1404_v52 }
  0x73   :  { %v1341_v24 = vadd.f32 %v1406_v23, %v1405_v58  ;;  %vm1321_vm1 = vcmp.gt.f32.partialorder %v1405_v58, 0.0  ;;  %vm1322_vm2 = vcmp.gt.f32.partialorder %v1406_v23, 0.0 }
  0x74   :  { %1850 = vmatpush3.bf16.msra.mxu1 %v1847_v60  ;;  %1946 = vmatpush3.bf16.msra.mxu0 %v1943_v62 }
  0x75   :  { %1852 = vmatprep.subr.bf16.mxu1 %v1851_v7  ;;  %1948 = vmatprep.subr.bf16.mxu0 %v1947_v8 }
  0x78   :  { %1854 = vmatpush3.bf16.msra.mxu1 %v1851_v7  ;;  %1950 = vmatpush3.bf16.msra.mxu0 %v1947_v8 }
  0x79   :  { %1856 = vmatprep.subr.bf16.mxu1 %v1855_v9  ;;  %1952 = vmatprep.subr.bf16.mxu0 %v2227_v10 }
  0x7b   :  { %1607 = vmatmul.mubr.f32.vlgmr.msra.gmra.mrb[0].mxu1 %v2322_v49  ;;  %1712 = vmatmul.mubr.f32.vlgmr.msra.gmra.mrb[0].mxu0 %v2322_v49 }
  0x7c   :  { %1858 = vmatpush3.bf16.msra.mxu1 %v1855_v9  ;;  %1954 = vmatpush3.bf16.msra.mxu0 %v2227_v10  ;;  %v1871_v10 = vpack.c.bf16 %v2397_v21, %v2392_v20 }
  0x7d   :  { %1860 = vmatprep.subr.bf16.mxu1 %v1859_v28  ;;  %1956 = vmatprep.subr.bf16.mxu0 %v2231_v13 }
  0x7e   :  { %1641 = vmatprep.mubr.f32.mxu1 %v2333_v53  ;;  %1746 = vmatprep.mubr.f32.mxu0 %v2315_v45 }
  0x80   :  { %1862 = vmatpush3.bf16.msra.mxu1 %v1859_v28  ;;  %1958 = vmatpush3.bf16.msra.mxu0 %v2231_v13  ;;  %v1875_v13 = vpack.c.bf16 %v2416_v59, %v2411_v27 }
  0x81   :  { %1864 = vmatprep.subr.bf16.mxu1 %v1863_v35  ;;  %1960 = vmatprep.subr.bf16.mxu0 %v2252_v19 }
  0x84   :  { %1866 = vmatpush3.bf16.msra.mxu1 %v1863_v35  ;;  %1962 = vmatpush3.bf16.msra.mxu0 %v2252_v19  ;;  %v1879_v19 = vpack.c.bf16 %v2430_v63, %v2425_v61 }
  0x85   :  { %1868 = vmatprep.subr.bf16.mxu1 %v1867_v36  ;;  %1964 = vmatprep.subr.bf16.mxu0 %v2269_v25 }
  0x88   :  { %1870 = vmatpush3.bf16.msra.mxu1 %v1867_v36  ;;  %1966 = vmatpush3.bf16.msra.mxu0 %v2269_v25  ;;  %v1883_v25 = vpack.c.bf16 %v2446_v14, %v2441_v38 }
  0x89   :  { %1872 = vmatprep.subr.bf16.mxu1 %v1871_v10  ;;  %1968 = vmatprep.subr.bf16.mxu0 %v2291_v34 }
  0x8c   :  { %1874 = vmatpush3.bf16.msra.mxu1 %v1871_v10  ;;  %1970 = vmatpush3.bf16.msra.mxu0 %v2291_v34  ;;  %v779_v34 = vld [vmem:[#allocation6] sm:$0xff] }
  0x8d   :  { %1876 = vmatprep.subr.bf16.mxu1 %v1875_v13  ;;  %1972 = vmatprep.subr.bf16.mxu0 %v2305_v40 }
  0x90   :  { %1878 = vmatpush3.bf16.msra.mxu1 %v1875_v13  ;;  %1974 = vmatpush3.bf16.msra.mxu0 %v2305_v40  ;;  %v791_v40 = vsel %vm789_vm0, %v779_v34, 0 }
  0x91   :  { %1880 = vmatprep.subr.bf16.mxu1 %v1879_v19  ;;  %1976 = vmatprep.subr.bf16.mxu0 %v2328_v50  ;;  %v863_v43 = vand.u32 4294901760, %v791_v40 }
  0x93   :  { %v864_v45 = vsub.f32 %v791_v40, %v863_v43 }
  0x94   :  { %1882 = vmatpush3.bf16.msra.mxu1 %v1879_v19  ;;  %1978 = vmatpush3.bf16.msra.mxu0 %v2328_v50 }
  0x95   :  { %1884 = vmatprep.subr.bf16.mxu1 %v1883_v25  ;;  %1980 = vmatprep.subr.bf16.mxu0 %v2375_v2  ;;  %v865_v48 = vand.u32 4294901760, %v864_v45 }
  0x97   :  { %v866_v53 = vsub.f32 %v864_v45, %v865_v48 }
  0x98   :  { %1886 = vmatpush3.bf16.msra.mxu1 %v1883_v25  ;;  %1982 = vmatpush3.bf16.msra.mxu0 %v2375_v2 }
  0x99   :  { %v867_v57 = vand.u32 4294901760, %v866_v53 }
  0x9b   :  { %1642 = vmatmul.mubr.f32.vlgmr.msra.gmra.mrb[0].mxu1 %v2338_v54  ;;  %1747 = vmatmul.mubr.f32.vlgmr.msra.gmra.mrb[0].mxu0 %v2322_v49  ;;  %v780_v49 = vld [vmem:[#allocation6 + $0x8] sm:$0xff] }
  0x9c   :  { %1774 = vmatprep.mubr.f32.mxu1 %v865_v48  ;;  %1753 = vmatprep.mubr.f32.mxu0 %v867_v57  ;;  %v794_v54 = vsel %vm789_vm0, %v780_v49, 0 }
  0x9d   :  { %v873_v21 = vand.u32 4294901760, %v794_v54 }
  0x9f   :  { %v874_v27 = vsub.f32 %v794_v54, %v873_v21 }
  0xa1   :  { %v875_v29 = vand.u32 4294901760, %v874_v27 }
  0xa3   :  { %v876_v63 = vsub.f32 %v874_v27, %v875_v29 }
  0xa5   :  { %v877_v12 = vand.u32 4294901760, %v876_v63 }
 0x16e   :  { %v1643_v50 = vpop.f32.mrb[0].mxu1  ;;  %v1748_v56 = vpop.f32.mrb[0].mxu0 }
 0x16f   :  { %v2493_v0 = vadd.f32 %v1748_v56, %v1643_v50  ;;  %v453_v1 = vpop.f32.mrb[1].mxu1  ;;  %v769_v2 = vpop.f32.mrb[1].mxu0 }
 0x170   :  { %v2495_v20 = vadd.f32 %v769_v2, %v453_v1 }
 0x172   :  { %783 = vrot.lane.b32.xlu0 %v2495_v20, %s2140_s2 }
 0x176   :  { %785 = vrot.lane.b32.xlu0 %v2493_v0, %s2140_s2 }
 0x1e4   :  { %v784_v59 = vpop.permute.xlu0 %783 }
 0x1e5   :  { %v797_v30 = vand.u32 4294901760, %v784_v59 }
 0x1e7   :  { %v885_v31 = vsub.f32 %v784_v59, %v797_v30 }
 0x1e8   :  { %v786_v55 = vpop.permute.xlu0 %785 }
 0x1e9   :  { %v800_v61 = vand.u32 4294901760, %v786_v55  ;;  %v886_v4 = vand.u32 4294901760, %v885_v31 }
 0x1eb   :  { %v1983_v5 = vpack.c.bf16 %v800_v61, %v797_v30  ;;  %v892_v11 = vsub.f32 %v786_v55, %v800_v61  ;;  %v887_v32 = vsub.f32 %v885_v31, %v886_v4 }
 0x1ed   :  { %1984 = vmatprep.subr.bf16.mxu0 %v1983_v5  ;;  %1996 = vmatprep.subr.bf16.mxu1 %v1983_v5  ;;  %v893_v18 = vand.u32 4294901760, %v892_v11  ;;  %v888_v38 = vand.u32 4294901760, %v887_v32  ;;  %v1991_v22 = vpack.c.bf16 %v892_v11, %v885_v31 }
 0x1ee   :  { %1986 = vmatpush3.bf16.msra.mxu0 %v1983_v5  ;;  %1998 = vmatpush3.bf16.msra.mxu1 %v1983_v5 }
 0x1ef   :  { %v1999_v37 = vpack.c.bf16 %v893_v18, %v886_v4  ;;  %v894_v33 = vsub.f32 %v892_v11, %v893_v18 }
 0x1f1   :  { %1754 = vmatmul.mubr.f32.vlgmr.msra.gmra.mrb[2].mxu0 %v877_v12  ;;  %1775 = vmatmul.mubr.f32.vlgmr.msra.gmra.mrb[2].mxu1 %v875_v29  ;;  %v895_v14 = vand.u32 4294901760, %v894_v33 }
 0x1f2   :  { %2000 = vmatprep.subr.bf16.mxu1 %v1999_v37  ;;  %1760 = vmatprep.mubr.f32.mxu0 %v863_v43 }
 0x1f3   :  { %2002 = vmatpush3.bf16.msra.mxu1 %v1999_v37  ;;  %v1987_v15 = vpack.c.bf16 %v895_v14, %v888_v38  ;;  %1781 = vmatprep.mubr.f32.mxu1 %v863_v43 }
 0x1f4   :  { %2004 = vmatprep.subr.bf16.mxu1 %v1983_v5 }
 0x1f5   :  { %1988 = vmatprep.subr.bf16.mxu0 %v1987_v15 }
 0x1f6   :  { %1990 = vmatpush3.bf16.msra.mxu0 %v1987_v15 }
 0x1f7   :  { %1992 = vmatprep.subr.bf16.mxu0 %v1991_v22 }
 0x1f9   :  { %1761 = vmatmul.mubr.f32.vlgmr.msra.gmra.mrb[2].mxu0 %v873_v21  ;;  %1782 = vmatmul.mubr.f32.vlgmr.msra.gmra.mrb[2].mxu1 %v873_v21 }
 0x1fa   :  { %2006 = vmatpush3.bf16.msra.mxu1 %v1983_v5  ;;  %1994 = vmatpush3.bf16.msra.mxu0 %v1991_v22 }
 0x1fb   :  { %1767 = vmatprep.mubr.f32.mxu0 %v864_v45  ;;  %1788 = vmatprep.mubr.f32.mxu1 %v863_v43 }
 0x201   :  { %1768 = vmatmul.mubr.f32.vlgmr.msra.gmra.mrb[2].mxu0 %v874_v27  ;;  %1789 = vmatmul.mubr.f32.vlgmr.msra.gmra.mrb[2].mxu1 %v873_v21 }
 0x2d4   :  { %v1769_v44 = vpop.f32.mrb[2].mxu0  ;;  %v1790_v46 = vpop.f32.mrb[2].mxu1 }
 0x2d5   :  { %v2009_v47 = vadd.f32 %v1790_v46, %v1769_v44  ;;  %v1042_v41 = vpop.f32.mrb[3].mxu0  ;;  %v1288_v51 = vpop.f32.mrb[3].mxu1 }
 0x2d6   :  { %v2010_v42 = vadd.f32 %v1288_v51, %v1042_v41 }
 0x2d8   :  { %1300 = vperm.xlu1 %2041, %v2010_v42  }
 0x2dc   :  { %1305 = vperm.xlu1 %2041, %v2009_v47  }
 0x300   :  { %1342 = vadd.xlane.f32.xlu1 %v1341_v24 }
 0x357   :  { %v1301_v26 = vpop.permute.xlu1 %1300 }
 0x358   :  { %v1308_v60 = vadd.f32 %v2495_v20, %v1301_v26 }
 0x35a   :  { %v1314_v62 = vadd.f32 1e-07, %v1308_v60 }
 0x35b   :  { %v1306_v3 = vpop.permute.xlu1 %1305 }
 0x35c   :  { %2047 = vlog2.f32 %v1314_v62  ;;  %v1309_v6 = vadd.f32 %v2493_v0, %v1306_v3 }
 0x35e   :  { %v1315_v7 = vadd.f32 1e-07, %v1309_v6 }
 0x360   :  { %2049 = vlog2.f32 %v1315_v7 }
 0x366   :  { %v2048_v8 = vpop.eup %2047 }
 0x367   :  { %v1317_v9 = vmul.f32 0.6931472, %v2048_v8 }
 0x369   :  { %v1323_v36 = vsub.f32 %v2239_v16, %v1317_v9 }
 0x36a   :  { %v2050_v28 = vpop.eup %2049 }
 0x36b   :  { %v1319_v35 = vmul.f32 0.6931472, %v2050_v28  ;;  %v1325_v13 = vsel %vm1321_vm1, %v1323_v36, 0.0 }
 0x36d   :  { %v1324_v10 = vsub.f32 %v2241_v17, %v1319_v35 }
 0x36f   :  { %v1326_v19 = vsel %vm1322_vm2, %v1324_v10, 0.0 }
 0x370   :  { %v1327_v25 = vadd.f32 %v1326_v19, %v1325_v13 }
 0x372   :  { %1328 = vadd.xlane.f32.xlu0 %v1327_v25 }
 0x38d   :  { %v1343_v34 = vpop.xlane.xlu1 %1342 }
 0x38e   :  { %v1344_v40 = vrot.slane %v1343_v34, 4 }
 0x390   :  { %v1345_v43 = vadd.f32 %v1344_v40, %v1343_v34 }
 0x392   :  { %v1346_v45 = vrot.slane %v1345_v43, 2 }
 0x394   :  { %v1347_v56 = vadd.f32 %v1346_v45, %v1345_v43 }
 0x396   :  { %v1348_v1 = vrot.slane %v1347_v56, 1 }
 0x398   :  { %v1349_v20 = vadd.f32 %v1348_v1, %v1347_v56 }
 0x3ff   :  { %v1329_v48 = vpop.xlane.xlu0 %1328 }
 0x400   :  { %v1330_v53 = vrot.slane %v1329_v48, 4 }
 0x402   :  { %v1331_v50 = vadd.f32 %v1330_v53, %v1329_v48 }
 0x404   :  { %v1332_v57 = vrot.slane %v1331_v50, 2 }
 0x406   :  { %v1333_v0 = vadd.f32 %v1332_v57, %v1331_v50 }
 0x408   :  { %v1334_v16 = vrot.slane %v1333_v0, 1 }
 0x40a   :  { %v1335_v2 = vadd.f32 %v1334_v16, %v1333_v0 }
 0x40c   :  { %2027 = vpush %v1335_v2 }
 0x40d   :  { %2029 = vpush %v1349_v20 }
 0x43d   :  { %s2028_s3 = spop %2027 }
 0x43e   :  { %s2030_s27 = spop %2029  ;;  %s1377_s28 = ssub.f32 0.0, %s2028_s3 }
 0x43f   :  { %p1374_p10 = scmp.gt.f32.partialorder %s2030_s27, 0.0 }
 0x441   :  { %s2525_s27 = smov (!%p1374_p10, %s2030_s27), 1.0 }
 0x442   :  { %v1378_v17 = vstv %s2525_s27 }
 0x443   :  { %2051 = vrcp.f32 %v1378_v17 }
 0x44d   :  { %v2052_v49 = vpop.eup %2051 }
 0x44e   :  { %2031 = vpush %v2052_v49 }
 0x47f   :  { %s2032_s29 = spop %2031 }
 0x480   :  { %s1381_s30 = smul.f32 %s2032_s29, %s1377_s28 }
 0x482   :  { %1383 = sst [smem:[#allocation9]] %s1381_s30 }
 0x483   :  { %2128 = shalt.err (!%p2125_p13)
}
 0x484   :  { %s2142_s12 = smov [#allocation9]  }
 0x485   :  { %1391 = dma.smem_to_hbm %s2142_s12, 16, %s2523_s4, [#allocation5]  }
 0x486   :  { %2133 = dma.done.wait [#allocation5], 16  }
 0x487   :  { %2134 = vsyncadd [#allocation5], 4294967280 }
 0x488   :  { %1395 = sfence }
 0x489   :  { %1396 = vsyncpa [#allocation4], 1 }
 0x48a   :  { %1397 = vsyncpa [#allocation7], 1 }
 0x48b   :  { %1398 = vsyncpa [#allocation5], 1 }

</bundles_post_ra>
